<compile_context>
chip_gen: v6e
topology: v6e:2x2x1
jax: 0.10.0
libtpu: 0.0.40
codegen_flags: <defaults>
</compile_context>

<pallas_src>
import functools

import jax
import jax.numpy as jnp
from jax import lax
from jax.experimental import pallas as pl
from jax.experimental.pallas import tpu as pltpu


# ----------------------------- Pallas kernel --------------------------------

def dcgru_kernel(xflat_ref, cbd_ref, cm_ref, wx_ref, whru_ref, whc_ref, b_ref,
                 hseq_ref, gx_ref, basis_ref, *, T, N, Din, H, K):
    """Single-invocation DCGRU.

    xflat_ref : (T*N, Din)        bf16  node features, all timesteps stacked
    cbd_ref   : (K-1, T*N, T*N)   bf16  blockdiag(T_k(L_t)) for k = 1..K-1
    cm_ref    : (T, K-1, N, N)    bf16  per-step T_k(L_t) for k = 1..K-1
    wx_ref    : (K*Din, 3H)       bf16  fused x-path weights [r | u | c]
    whru_ref  : (K*H, 2H)         bf16  fused h-path weights [r | u]
    whc_ref   : (K*H, H)          bf16  h-path weights for the memory gate
    b_ref     : (1, 3H)           f32   fused biases [br | bu | bc]
    hseq_ref  : (T, N, H)         f32   output hidden sequence
    gx_ref    : (T*N, 3H)         f32   scratch: precomputed x-path pre-activations
    basis_ref : (N, K*H)          bf16  scratch: per-step Chebyshev basis
    """

    # ---- phase 1: x-path for all timesteps at once (block-diagonal operator) ----
    x0 = xflat_ref[...]                                        # (T*N, Din) bf16
    pieces = [x0]
    for k in range(1, K):                                      # independent dots
        pieces.append(
            jnp.dot(cbd_ref[k - 1], x0,
                    preferred_element_type=jnp.float32).astype(jnp.bfloat16))
    txall = jnp.concatenate(pieces, axis=-1)                   # (T*N, K*Din) bf16
    gx_ref[...] = (jnp.dot(txall, wx_ref[...],
                           preferred_element_type=jnp.float32) + b_ref[...])

    # loop-invariant weight loads hoisted out of the recurrence
    whru = whru_ref[...]                                       # (K*H, 2H) bf16
    whc = whc_ref[...]                                         # (K*H,  H) bf16

    def fill_basis(cm_t, f):
        # basis_ref[:, k*H:(k+1)*H] = T_k(L_t) @ f  — static lane offsets, no concat.
        f_bf = f.astype(jnp.bfloat16)
        basis_ref[:, 0:H] = f_bf
        for k in range(1, K):
            basis_ref[:, k * H:(k + 1) * H] = jnp.dot(
                cm_t[k - 1], f_bf,
                preferred_element_type=jnp.float32).astype(jnp.bfloat16)
        return basis_ref[...]

    # ---- phase 2: sequential GRU recurrence over time ---------------------------
    def step(t, h):
        row = pl.multiple_of(t * N, N)
        gx_t = gx_ref[pl.ds(row, N), :]         # (N, 3H) f32: [r|u|c] x-part + bias
        cm_t = cm_ref[t]                        # (K-1, N, N) bf16

        th = fill_basis(cm_t, h)                # (N, K*H) bf16
        ru = jax.nn.sigmoid(
            gx_t[:, :2 * H]
            + jnp.dot(th, whru, preferred_element_type=jnp.float32))
        r = ru[:, :H]
        u = ru[:, H:]

        thr = fill_basis(cm_t, r * h)           # (N, K*H) bf16
        c = jnp.tanh(
            gx_t[:, 2 * H:]
            + jnp.dot(thr, whc, preferred_element_type=jnp.float32))

        h_new = u * h + (1.0 - u) * c
        hseq_ref[t] = h_new.astype(hseq_ref.dtype)
        return h_new

    h0 = jnp.zeros((N, H), jnp.float32)
    lax.fori_loop(0, T, step, h0)


# --------------------------------- wrapper -----------------------------------

def dcgru_forward(x_seq, L_seq, Wr, Wu, Wc, biases):
    """x_seq: [T,N,Din]; L_seq: [T,N,N]; W*: [K, Din+H, H]; biases: [3,H]."""
    T, N, Din = x_seq.shape
    K, F, H = Wr.shape
    assert F == Din + H

    # Split each ChebConv weight into x-part / h-part (valid because the Chebyshev
    # recurrence acts on the node axis, hence is columnwise linear), flatten the K
    # terms into the contraction dim, and fuse gates along the output dim.
    def split(W):
        wx = W[:, :Din, :].reshape(K * Din, H)   # row index = k*Din + d
        wh = W[:, Din:, :].reshape(K * H, H)     # row index = k*H  + j
        return wx, wh

    wrx, wrh = split(Wr)
    wux, wuh = split(Wu)
    wcx, wch = split(Wc)

    wx_all = jnp.concatenate([wrx, wux, wcx], axis=1).astype(jnp.bfloat16)  # (K*Din,3H)
    wh_ru = jnp.concatenate([wrh, wuh], axis=1).astype(jnp.bfloat16)        # (K*H, 2H)
    wh_c = wch.astype(jnp.bfloat16)                                         # (K*H,  H)
    b_all = jnp.concatenate([biases[0], biases[1], biases[2]])[None, :]     # (1, 3H) f32

    # Chebyshev polynomial matrices T_k(L_t) for k = 1..K-1 (computed in f32).
    nk = max(K - 1, 1)
    if K > 1:
        mats = [L_seq]
        tkm2 = jnp.broadcast_to(jnp.eye(N, dtype=jnp.float32), (T, N, N))
        tkm1 = L_seq
        for _ in range(2, K):
            tk = 2.0 * jnp.einsum('tij,tjk->tik', L_seq, tkm1) - tkm2
            mats.append(tk)
            tkm2, tkm1 = tkm1, tk
        cm = jnp.stack(mats, axis=1)                        # (T, K-1, N, N)
    else:
        cm = jnp.zeros((T, nk, N, N), jnp.float32)          # dummy (unused in kernel)

    # Block-diagonal versions for the time-batched x-path: (nk, T*N, T*N).
    eye_t = jnp.eye(T, dtype=jnp.float32)
    cbd = jnp.einsum('ts,tkij->ktisj', eye_t, cm).reshape(nk, T * N, T * N)

    cm_bf = cm.astype(jnp.bfloat16)
    cbd_bf = cbd.astype(jnp.bfloat16)
    x_flat = x_seq.reshape(T * N, Din).astype(jnp.bfloat16)

    # Advisory cost estimate so XLA can schedule around the custom call.
    flops = (nk * 2 * (T * N) ** 2 * Din                     # batched x-path cheb dots
             + 2 * (T * N) * (K * Din) * (3 * H)             # fused x-path gate matmul
             + T * (2 * nk * 2 * N * N * H                   # per-step basis dots (x2)
                    + 2 * N * (K * H) * (3 * H)              # per-step gate matmuls
                    + 6 * N * H))                            # gate blend elementwise
    bytes_accessed = (x_flat.size * 2 + cbd_bf.size * 2 + cm_bf.size * 2
                      + wx_all.size * 2 + wh_ru.size * 2 + wh_c.size * 2
                      + b_all.size * 4 + T * N * H * 4)
    cost = pl.CostEstimate(flops=flops, transcendentals=T * N * 3 * H,
                           bytes_accessed=bytes_accessed)

    kernel = functools.partial(dcgru_kernel, T=T, N=N, Din=Din, H=H, K=K)
    hseq = pl.pallas_call(
        kernel,
        out_shape=jax.ShapeDtypeStruct((T, N, H), jnp.float32),
        grid_spec=pltpu.PrefetchScalarGridSpec(
            num_scalar_prefetch=0,
            grid=(1,),                       # single invocation; recurrence in-kernel
            in_specs=[
                pl.BlockSpec((T * N, Din), lambda i: (0, 0)),
                pl.BlockSpec((nk, T * N, T * N), lambda i: (0, 0, 0)),
                pl.BlockSpec((T, nk, N, N), lambda i: (0, 0, 0, 0)),
                pl.BlockSpec((K * Din, 3 * H), lambda i: (0, 0)),
                pl.BlockSpec((K * H, 2 * H), lambda i: (0, 0)),
                pl.BlockSpec((K * H, H), lambda i: (0, 0)),
                pl.BlockSpec((1, 3 * H), lambda i: (0, 0)),
            ],
            out_specs=pl.BlockSpec((T, N, H), lambda i: (0, 0, 0)),
            scratch_shapes=[
                pltpu.VMEM((T * N, 3 * H), jnp.float32),     # precomputed x-path
                pltpu.VMEM((N, K * H), jnp.bfloat16),        # per-step Chebyshev basis
            ],
        ),
        compiler_params=pltpu.CompilerParams(
            dimension_semantics=("arbitrary",)),             # sequential recurrence
        cost_estimate=cost,
    )(x_flat, cbd_bf, cm_bf, wx_all, wh_ru, wh_c, b_all)

    return hseq[-1], hseq


# -------------------- glue: graph -> dense scaled Laplacian ------------------

def build_scaled_laplacian(edge_index, edge_weight, num_nodes):
    """PyG ChebConv 'sym' normalization with default lambda_max=2.0:
       L_hat = -D^{-1/2} A D^{-1/2}, zero diagonal (self-loops removed)."""
    # TODO(synk): the sparse scatter normalization is done host-side in JAX (no
    # in-kernel gather/scatter equivalent at these sizes).
    src, dst = edge_index[0], edge_index[1]
    w = jnp.where(src == dst, 0.0, edge_weight)          # remove self-loops
    A = jnp.zeros((num_nodes, num_nodes), jnp.float32).at[dst, src].add(w)
    deg = A.sum(axis=0)                                   # scatter over source nodes
    dinv = jnp.where(deg > 0, 1.0 / jnp.sqrt(deg), 0.0)
    return -(dinv[:, None] * A * dinv[None, :])


# ----------------------------- pure-JAX reference ----------------------------

def ref_dcgru(x_seq, L_seq, Wr, Wu, Wc, biases, hidden_dim):
    K = Wr.shape[0]
    T, N, _ = x_seq.shape

    def cheb(L, feat, W, b):
        Ts = [feat]
        if K > 1:
            Ts.append(L @ feat)
        for _ in range(2, K):
            Ts.append(2.0 * (L @ Ts[-1]) - Ts[-2])
        out = b
        for k in range(K):
            out = out + Ts[k] @ W[k]
        return out

    h = jnp.zeros((N, hidden_dim), jnp.float32)
    hs = []
    for t in range(T):
        x, L = x_seq[t], L_seq[t]
        comb = jnp.concatenate([x, h], axis=1)
        r = jax.nn.sigmoid(cheb(L, comb, Wr, biases[0]))
        u = jax.nn.sigmoid(cheb(L, comb, Wu, biases[1]))
        c = jnp.tanh(cheb(L, jnp.concatenate([x, r * h], axis=1), Wc, biases[2]))
        h = u * h + (1.0 - u) * c
        hs.append(h)
    return h, jnp.stack(hs)


# ----------------------------------- main ------------------------------------

if __name__ == "__main__":
    T, N = 8, 16          # seq length, number of graph nodes
    input_dim, hidden_dim, K = 4, 32, 3
    F = input_dim + hidden_dim

    key = jax.random.PRNGKey(0)
    kx, kw1, kw2, kw3, kb, ka = jax.random.split(key, 6)

    # node-feature sequence
    x_seq = jax.random.normal(kx, (T, N, input_dim), jnp.float32)

    # ring graph, both directions (same topology each step, varying edge weights)
    src = jnp.arange(N, dtype=jnp.int32)
    dst = (src + 1) % N
    edge_index = jnp.stack([jnp.concatenate([src, dst]),
                            jnp.concatenate([dst, src])])          # [2, 2N]
    edge_attr_seq = jax.random.uniform(ka, (T, 2 * N), jnp.float32,
                                       minval=0.5, maxval=1.5)
    L_seq = jnp.stack([build_scaled_laplacian(edge_index, edge_attr_seq[t], N)
                       for t in range(T)])

    # deterministic parameter init (glorot-ish) for the three ChebConvs
    scale = (6.0 / (F + hidden_dim)) ** 0.5
    Wr = jax.random.uniform(kw1, (K, F, hidden_dim), jnp.float32, -scale, scale)
    Wu = jax.random.uniform(kw2, (K, F, hidden_dim), jnp.float32, -scale, scale)
    Wc = jax.random.uniform(kw3, (K, F, hidden_dim), jnp.float32, -scale, scale)
    biases = jax.random.uniform(kb, (3, hidden_dim), jnp.float32, -0.1, 0.1)

    h_final, hseq = jax.jit(dcgru_forward)(x_seq, L_seq, Wr, Wu, Wc, biases)
    jax.block_until_ready(h_final)

    # sanity check vs. pure-JAX f32 reference (tolerance covers bf16 MXU operands)
    h_ref, hseq_ref = ref_dcgru(x_seq, L_seq, Wr, Wu, Wc, biases, hidden_dim)
    err = float(jnp.max(jnp.abs(hseq - hseq_ref)))
    assert err < 3e-2, f"mismatch vs reference: max abs err = {err}"

    print("KERNEL_OK")
</pallas_src>

<mosaic_0001>
module attributes {stable_mosaic.version = 11 : i64} {
  func.func @dcgru_kernel(%arg0: i32, %arg1: memref<128x4xbf16, #tpu.memory_space<vmem>>, %arg2: memref<2x128x128xbf16, #tpu.memory_space<vmem>>, %arg3: memref<8x2x16x16xbf16, #tpu.memory_space<vmem>>, %arg4: memref<12x96xbf16, #tpu.memory_space<vmem>>, %arg5: memref<96x64xbf16, #tpu.memory_space<vmem>>, %arg6: memref<96x32xbf16, #tpu.memory_space<vmem>>, %arg7: memref<1x96xf32, #tpu.memory_space<vmem>>, %arg8: memref<8x16x32xf32, #tpu.memory_space<vmem>>, %arg9: memref<128x96xf32, #tpu.memory_space<vmem>>, %arg10: memref<16x96xbf16, #tpu.memory_space<vmem>>) attributes {dimension_semantics = [#tpu.dimension_semantics<arbitrary>], iteration_bounds = array<i64: 1>, scalar_prefetch = 0 : i64, scratch_operands = 2 : i64, tpu.core_type = #tpu.core_type<tc>, window_params = [{pipeline_mode = #tpu.pipeline_mode<synchronous>, transform_indices = @transform_0, window_bounds = array<i64: 128, 4>}, {pipeline_mode = #tpu.pipeline_mode<synchronous>, transform_indices = @transform_1, window_bounds = array<i64: 2, 128, 128>}, {pipeline_mode = #tpu.pipeline_mode<synchronous>, transform_indices = @transform_2, window_bounds = array<i64: 8, 2, 16, 16>}, {pipeline_mode = #tpu.pipeline_mode<synchronous>, transform_indices = @transform_3, window_bounds = array<i64: 12, 96>}, {pipeline_mode = #tpu.pipeline_mode<synchronous>, transform_indices = @transform_4, window_bounds = array<i64: 96, 64>}, {pipeline_mode = #tpu.pipeline_mode<synchronous>, transform_indices = @transform_5, window_bounds = array<i64: 96, 32>}, {pipeline_mode = #tpu.pipeline_mode<synchronous>, transform_indices = @transform_6, window_bounds = array<i64: 1, 96>}, {pipeline_mode = #tpu.pipeline_mode<synchronous>, transform_indices = @transform_7, window_bounds = array<i64: 8, 16, 32>}]} {
    %c0 = arith.constant 0 : index
    %c0_0 = arith.constant 0 : index
    %0 = vector.load %arg1[%c0, %c0_0] : memref<128x4xbf16, #tpu.memory_space<vmem>>, vector<128x4xbf16>
    %c0_1 = arith.constant 0 : index
    %c0_2 = arith.constant 0 : index
    %c0_3 = arith.constant 0 : index
    %1 = vector.load %arg2[%c0_1, %c0_2, %c0_3] : memref<2x128x128xbf16, #tpu.memory_space<vmem>>, vector<1x128x128xbf16>
    %2 = vector.shape_cast %1 : vector<1x128x128xbf16> to vector<128x128xbf16>
    %cst = arith.constant dense<0.000000e+00> : vector<128x4xf32>
    %3 = tpu.matmul %2, %0, %cst {dimension_numbers = #tpu.dot_dimension_numbers<[1], [0], [0], [1], [0, 0, 1, 1], [], []>} : vector<128x128xbf16>, vector<128x4xbf16>, vector<128x4xf32> -> vector<128x4xf32>
    %4 = arith.truncf %3 : vector<128x4xf32> to vector<128x4xbf16>
    %c1 = arith.constant 1 : index
    %c0_4 = arith.constant 0 : index
    %c0_5 = arith.constant 0 : index
    %5 = vector.load %arg2[%c1, %c0_4, %c0_5] : memref<2x128x128xbf16, #tpu.memory_space<vmem>>, vector<1x128x128xbf16>
    %6 = vector.shape_cast %5 : vector<1x128x128xbf16> to vector<128x128xbf16>
    %cst_6 = arith.constant dense<0.000000e+00> : vector<128x4xf32>
    %7 = tpu.matmul %6, %0, %cst_6 {dimension_numbers = #tpu.dot_dimension_numbers<[1], [0], [0], [1], [0, 0, 1, 1], [], []>} : vector<128x128xbf16>, vector<128x4xbf16>, vector<128x4xf32> -> vector<128x4xf32>
    %8 = arith.truncf %7 : vector<128x4xf32> to vector<128x4xbf16>
    %9 = tpu.concatenate %0, %4, %8 in 1 : vector<128x4xbf16>, vector<128x4xbf16>, vector<128x4xbf16> -> vector<128x12xbf16>
    %c0_7 = arith.constant 0 : index
    %c0_8 = arith.constant 0 : index
    %10 = vector.load %arg4[%c0_7, %c0_8] : memref<12x96xbf16, #tpu.memory_space<vmem>>, vector<12x96xbf16>
    %cst_9 = arith.constant dense<0.000000e+00> : vector<128x96xf32>
    %11 = tpu.matmul %9, %10, %cst_9 {dimension_numbers = #tpu.dot_dimension_numbers<[1], [0], [0], [1], [0, 0, 1, 1], [], []>} : vector<128x12xbf16>, vector<12x96xbf16>, vector<128x96xf32> -> vector<128x96xf32>
    %c0_10 = arith.constant 0 : index
    %c0_11 = arith.constant 0 : index
    %12 = vector.load %arg7[%c0_10, %c0_11] : memref<1x96xf32, #tpu.memory_space<vmem>>, vector<1x96xf32>
    %13 = vector.broadcast %12 : vector<1x96xf32> to vector<128x96xf32>
    %14 = arith.addf %11, %13 : vector<128x96xf32>
    %c0_12 = arith.constant 0 : index
    %c0_13 = arith.constant 0 : index
    %15 = vector.load %arg9[%c0_12, %c0_13] : memref<128x96xf32, #tpu.memory_space<vmem>>, vector<128x96xf32>
    tpu.vector_store %arg9[%c0_12, %c0_13], %14 {strides = array<i32>} : memref<128x96xf32, #tpu.memory_space<vmem>>, vector<128x96xf32>,
    %c0_14 = arith.constant 0 : index
    %c0_15 = arith.constant 0 : index
    %16 = vector.load %arg5[%c0_14, %c0_15] : memref<96x64xbf16, #tpu.memory_space<vmem>>, vector<96x64xbf16>
    %c0_16 = arith.constant 0 : index
    %c0_17 = arith.constant 0 : index
    %17 = vector.load %arg6[%c0_16, %c0_17] : memref<96x32xbf16, #tpu.memory_space<vmem>>, vector<96x32xbf16>
    %cst_18 = arith.constant 0.000000e+00 : f32
    %18 = vector.broadcast %cst_18 : f32 to vector<16x32xf32>
    %c0_i32 = arith.constant 0 : i32
    %c8_i32 = arith.constant 8 : i32
    %19 = arith.addi %c0_i32, %c8_i32 : i32
    %c1_i32 = arith.constant 1 : i32
    %20 = scf.for %arg11 = %c0_i32 to %19 step %c1_i32 iter_args(%arg12 = %18) -> (vector<16x32xf32>)  : i32 {
      %c16_i32 = arith.constant 16 : i32
      %21 = arith.muli %arg11, %c16_i32 : i32
      %22 = tpu.assume_multiple %21, 16 : i32
      %23 = arith.index_cast %22 : i32 to index
      %c0_20 = arith.constant 0 : index
      %24 = vector.load %arg9[%23, %c0_20] : memref<128x96xf32, #tpu.memory_space<vmem>>, vector<16x96xf32>
      %25 = arith.index_cast %arg11 : i32 to index
      %c0_21 = arith.constant 0 : index
      %c0_22 = arith.constant 0 : index
      %c0_23 = arith.constant 0 : index
      %26 = vector.load %arg3[%25, %c0_21, %c0_22, %c0_23] : memref<8x2x16x16xbf16, #tpu.memory_space<vmem>>, vector<1x2x16x16xbf16>
      %27 = vector.shape_cast %26 : vector<1x2x16x16xbf16> to vector<2x16x16xbf16>
      %28 = arith.truncf %arg12 : vector<16x32xf32> to vector<16x32xbf16>
      %c0_24 = arith.constant 0 : index
      %c0_25 = arith.constant 0 : index
      %29 = vector.load %arg10[%c0_24, %c0_25] : memref<16x96xbf16, #tpu.memory_space<vmem>>, vector<16x32xbf16>
      tpu.vector_store %arg10[%c0_24, %c0_25], %28 {strides = array<i32>} : memref<16x96xbf16, #tpu.memory_space<vmem>>, vector<16x32xbf16>,
      %30 = vector.extract_strided_slice %27 {offsets = [0, 0, 0], sizes = [1, 16, 16], strides = [1, 1, 1]} : vector<2x16x16xbf16> to vector<1x16x16xbf16>
      %31 = vector.shape_cast %30 : vector<1x16x16xbf16> to vector<16x16xbf16>
      %cst_26 = arith.constant dense<0.000000e+00> : vector<16x32xf32>
      %32 = tpu.matmul %31, %28, %cst_26 {dimension_numbers = #tpu.dot_dimension_numbers<[1], [0], [0], [1], [0, 0, 1, 1], [], []>} : vector<16x16xbf16>, vector<16x32xbf16>, vector<16x32xf32> -> vector<16x32xf32>
      %33 = arith.truncf %32 : vector<16x32xf32> to vector<16x32xbf16>
      %c0_27 = arith.constant 0 : index
      %c32 = arith.constant 32 : index
      %34 = vector.load %arg10[%c0_27, %c32] : memref<16x96xbf16, #tpu.memory_space<vmem>>, vector<16x32xbf16>
      tpu.vector_store %arg10[%c0_27, %c32], %33 {strides = array<i32>} : memref<16x96xbf16, #tpu.memory_space<vmem>>, vector<16x32xbf16>,
      %35 = vector.extract_strided_slice %27 {offsets = [1, 0, 0], sizes = [1, 16, 16], strides = [1, 1, 1]} : vector<2x16x16xbf16> to vector<1x16x16xbf16>
      %36 = vector.shape_cast %35 : vector<1x16x16xbf16> to vector<16x16xbf16>
      %cst_28 = arith.constant dense<0.000000e+00> : vector<16x32xf32>
      %37 = tpu.matmul %36, %28, %cst_28 {dimension_numbers = #tpu.dot_dimension_numbers<[1], [0], [0], [1], [0, 0, 1, 1], [], []>} : vector<16x16xbf16>, vector<16x32xbf16>, vector<16x32xf32> -> vector<16x32xf32>
      %38 = arith.truncf %37 : vector<16x32xf32> to vector<16x32xbf16>
      %c0_29 = arith.constant 0 : index
      %c64 = arith.constant 64 : index
      %39 = vector.load %arg10[%c0_29, %c64] : memref<16x96xbf16, #tpu.memory_space<vmem>>, vector<16x32xbf16>
      tpu.vector_store %arg10[%c0_29, %c64], %38 {strides = array<i32>} : memref<16x96xbf16, #tpu.memory_space<vmem>>, vector<16x32xbf16>,
      %c0_30 = arith.constant 0 : index
      %c0_31 = arith.constant 0 : index
      %40 = vector.load %arg10[%c0_30, %c0_31] : memref<16x96xbf16, #tpu.memory_space<vmem>>, vector<16x96xbf16>
      %41 = vector.extract_strided_slice %24 {offsets = [0, 0], sizes = [16, 64], strides = [1, 1]} : vector<16x96xf32> to vector<16x64xf32>
      %cst_32 = arith.constant dense<0.000000e+00> : vector<16x64xf32>
      %42 = tpu.matmul %40, %16, %cst_32 {dimension_numbers = #tpu.dot_dimension_numbers<[1], [0], [0], [1], [0, 0, 1, 1], [], []>} : vector<16x96xbf16>, vector<96x64xbf16>, vector<16x64xf32> -> vector<16x64xf32>
      %43 = arith.addf %41, %42 : vector<16x64xf32>
      %44 = arith.negf %43 : vector<16x64xf32>
      %45 = math.exp %44 : vector<16x64xf32>
      %cst_33 = arith.constant 1.000000e+00 : f32
      %46 = vector.broadcast %cst_33 : f32 to vector<16x64xf32>
      %47 = arith.addf %46, %45 : vector<16x64xf32>
      %48 = arith.divf %46, %47 : vector<16x64xf32>
      %49 = vector.extract_strided_slice %48 {offsets = [0, 0], sizes = [16, 32], strides = [1, 1]} : vector<16x64xf32> to vector<16x32xf32>
      %50 = vector.extract_strided_slice %48 {offsets = [0, 32], sizes = [16, 32], strides = [1, 1]} : vector<16x64xf32> to vector<16x32xf32>
      %51 = arith.mulf %49, %arg12 : vector<16x32xf32>
      %52 = arith.truncf %51 : vector<16x32xf32> to vector<16x32xbf16>
      %c0_34 = arith.constant 0 : index
      %c0_35 = arith.constant 0 : index
      %53 = vector.load %arg10[%c0_34, %c0_35] : memref<16x96xbf16, #tpu.memory_space<vmem>>, vector<16x32xbf16>
      tpu.vector_store %arg10[%c0_34, %c0_35], %52 {strides = array<i32>} : memref<16x96xbf16, #tpu.memory_space<vmem>>, vector<16x32xbf16>,
      %54 = vector.extract_strided_slice %27 {offsets = [0, 0, 0], sizes = [1, 16, 16], strides = [1, 1, 1]} : vector<2x16x16xbf16> to vector<1x16x16xbf16>
      %55 = vector.shape_cast %54 : vector<1x16x16xbf16> to vector<16x16xbf16>
      %cst_36 = arith.constant dense<0.000000e+00> : vector<16x32xf32>
      %56 = tpu.matmul %55, %52, %cst_36 {dimension_numbers = #tpu.dot_dimension_numbers<[1], [0], [0], [1], [0, 0, 1, 1], [], []>} : vector<16x16xbf16>, vector<16x32xbf16>, vector<16x32xf32> -> vector<16x32xf32>
      %57 = arith.truncf %56 : vector<16x32xf32> to vector<16x32xbf16>
      %c0_37 = arith.constant 0 : index
      %c32_38 = arith.constant 32 : index
      %58 = vector.load %arg10[%c0_37, %c32_38] : memref<16x96xbf16, #tpu.memory_space<vmem>>, vector<16x32xbf16>
      tpu.vector_store %arg10[%c0_37, %c32_38], %57 {strides = array<i32>} : memref<16x96xbf16, #tpu.memory_space<vmem>>, vector<16x32xbf16>,
      %59 = vector.extract_strided_slice %27 {offsets = [1, 0, 0], sizes = [1, 16, 16], strides = [1, 1, 1]} : vector<2x16x16xbf16> to vector<1x16x16xbf16>
      %60 = vector.shape_cast %59 : vector<1x16x16xbf16> to vector<16x16xbf16>
      %cst_39 = arith.constant dense<0.000000e+00> : vector<16x32xf32>
      %61 = tpu.matmul %60, %52, %cst_39 {dimension_numbers = #tpu.dot_dimension_numbers<[1], [0], [0], [1], [0, 0, 1, 1], [], []>} : vector<16x16xbf16>, vector<16x32xbf16>, vector<16x32xf32> -> vector<16x32xf32>
      %62 = arith.truncf %61 : vector<16x32xf32> to vector<16x32xbf16>
      %c0_40 = arith.constant 0 : index
      %c64_41 = arith.constant 64 : index
      %63 = vector.load %arg10[%c0_40, %c64_41] : memref<16x96xbf16, #tpu.memory_space<vmem>>, vector<16x32xbf16>
      tpu.vector_store %arg10[%c0_40, %c64_41], %62 {strides = array<i32>} : memref<16x96xbf16, #tpu.memory_space<vmem>>, vector<16x32xbf16>,
      %c0_42 = arith.constant 0 : index
      %c0_43 = arith.constant 0 : index
      %64 = vector.load %arg10[%c0_42, %c0_43] : memref<16x96xbf16, #tpu.memory_space<vmem>>, vector<16x96xbf16>
      %65 = vector.extract_strided_slice %24 {offsets = [0, 64], sizes = [16, 32], strides = [1, 1]} : vector<16x96xf32> to vector<16x32xf32>
      %cst_44 = arith.constant dense<0.000000e+00> : vector<16x32xf32>
      %66 = tpu.matmul %64, %17, %cst_44 {dimension_numbers = #tpu.dot_dimension_numbers<[1], [0], [0], [1], [0, 0, 1, 1], [], []>} : vector<16x96xbf16>, vector<96x32xbf16>, vector<16x32xf32> -> vector<16x32xf32>
      %67 = arith.addf %65, %66 : vector<16x32xf32>
      %68 = math.tanh %67 : vector<16x32xf32>
      %69 = arith.mulf %50, %arg12 : vector<16x32xf32>
      %cst_45 = arith.constant 1.000000e+00 : f32
      %70 = vector.broadcast %cst_45 : f32 to vector<16x32xf32>
      %71 = arith.subf %70, %50 : vector<16x32xf32>
      %72 = arith.mulf %71, %68 : vector<16x32xf32>
      %73 = arith.addf %69, %72 : vector<16x32xf32>
      %74 = arith.index_cast %arg11 : i32 to index
      %c0_46 = arith.constant 0 : index
      %c0_47 = arith.constant 0 : index
      %75 = vector.load %arg8[%74, %c0_46, %c0_47] : memref<8x16x32xf32, #tpu.memory_space<vmem>>, vector<1x16x32xf32>
      %76 = vector.shape_cast %75 : vector<1x16x32xf32> to vector<16x32xf32>
      %77 = vector.shape_cast %73 : vector<16x32xf32> to vector<1x16x32xf32>
      tpu.vector_store %arg8[%74, %c0_46, %c0_47], %77 {strides = array<i32>} : memref<8x16x32xf32, #tpu.memory_space<vmem>>, vector<1x16x32xf32>,
      scf.yield %73 : vector<16x32xf32>
    }
    %c8_i32_19 = arith.constant 8 : i32
    return
  }
  func.func @transform_0(%arg0: i32) -> (i32, i32) {
    %c0_i32 = arith.constant 0 : i32
    %c0_i32_0 = arith.constant 0 : i32
    %c0_i32_1 = arith.constant 0 : i32
    return %c0_i32, %c0_i32_0 : i32, i32
  }
  func.func @transform_1(%arg0: i32) -> (i32, i32, i32) {
    %c0_i32 = arith.constant 0 : i32
    %c0_i32_0 = arith.constant 0 : i32
    %c0_i32_1 = arith.constant 0 : i32
    %c0_i32_2 = arith.constant 0 : i32
    return %c0_i32, %c0_i32_0, %c0_i32_1 : i32, i32, i32
  }
  func.func @transform_2(%arg0: i32) -> (i32, i32, i32, i32) {
    %c0_i32 = arith.constant 0 : i32
    %c0_i32_0 = arith.constant 0 : i32
    %c0_i32_1 = arith.constant 0 : i32
    %c0_i32_2 = arith.constant 0 : i32
    %c0_i32_3 = arith.constant 0 : i32
    return %c0_i32, %c0_i32_0, %c0_i32_1, %c0_i32_2 : i32, i32, i32, i32
  }
  func.func @transform_3(%arg0: i32) -> (i32, i32) {
    %c0_i32 = arith.constant 0 : i32
    %c0_i32_0 = arith.constant 0 : i32
    %c0_i32_1 = arith.constant 0 : i32
    return %c0_i32, %c0_i32_0 : i32, i32
  }
  func.func @transform_4(%arg0: i32) -> (i32, i32) {
    %c0_i32 = arith.constant 0 : i32
    %c0_i32_0 = arith.constant 0 : i32
    %c0_i32_1 = arith.constant 0 : i32
    return %c0_i32, %c0_i32_0 : i32, i32
  }
  func.func @transform_5(%arg0: i32) -> (i32, i32) {
    %c0_i32 = arith.constant 0 : i32
    %c0_i32_0 = arith.constant 0 : i32
    %c0_i32_1 = arith.constant 0 : i32
    return %c0_i32, %c0_i32_0 : i32, i32
  }
  func.func @transform_6(%arg0: i32) -> (i32, i32) {
    %c0_i32 = arith.constant 0 : i32
    %c0_i32_0 = arith.constant 0 : i32
    %c0_i32_1 = arith.constant 0 : i32
    return %c0_i32, %c0_i32_0 : i32, i32
  }
  func.func @transform_7(%arg0: i32) -> (i32, i32, i32) {
    %c0_i32 = arith.constant 0 : i32
    %c0_i32_0 = arith.constant 0 : i32
    %c0_i32_1 = arith.constant 0 : i32
    %c0_i32_2 = arith.constant 0 : i32
    return %c0_i32, %c0_i32_0, %c0_i32_1 : i32, i32, i32
  }
}

</mosaic_0001>

<bundles_post_ra>
// kernel: dcgru_forward.1
= control target key start
LH: loop header
LB: loop body
LE: loop exit
PB: predicated region body
PF: predicated region fallthrough
CT: control target
= control target key end

     0   :  { %vm551_vm0 = vcmask 1045504   ;;  %s1642_s26 = smov 4   ;;  %vm478_vm1 = vcmask 31744   ;;  %vm503_vm2 = vcmask 64512   ;;  %vm534_vm3 = vcmask 97280   ;;  %s2157_s0 = inlined_call_operand.vmem [shape: bf16[128,4], index: 0, kind: input, shape index: {}]   ;;  %s2158_s2 = inlined_call_operand.vmem [shape: bf16[8,2,16,16], index: 2, kind: input, shape index: {}]   ;;  %s2159_s7 = inlined_call_operand.vmem [shape: f32[8,16,32], index: 7, kind: output, shape index: {}]   ;;  %s2160_s1 = inlined_call_operand.vmem [shape: bf16[2,128,128], index: 1, kind: input, shape index: {}]   ;;  %s2161_s3 = inlined_call_operand.vmem [shape: bf16[12,96], index: 3, kind: input, shape index: {}]   ;;  %s2162_s4 = inlined_call_operand.vmem [shape: bf16[96,64], index: 4, kind: input, shape index: {}]   ;;  %s2163_s5 = inlined_call_operand.vmem [shape: bf16[96,32], index: 5, kind: input, shape index: {}]   ;;  %s2164_s6 = inlined_call_operand.vmem [shape: f32[1,96], index: 6, kind: input, shape index: {}]  }
   0x1   :  { %v1691_v0 = vld [vmem:[%s2157_s0 + $0x38] sm:$0xff]   ;;  %v1696_v1 = vld [vmem:[%s2157_s0 + $0x30] sm:$0xff]   ;;  %v1707_v2 = vld [vmem:[%s2157_s0 + $0x28] sm:$0xff]   ;;  %vm652_vm4 = vcmask 785408  }
   0x2   :  { %1403 = vmatprep.subr.bf16.mxu0 %v1691_v0  ;;  %1435 = vmatprep.subr.bf16.mxu1 %v1691_v0  ;;  %v1714_v3 = vld [vmem:[%s2157_s0 + $0x20] sm:$0xff]   ;;  %v1731_v6 = vld [vmem:[%s2157_s0 + $0x18] sm:$0xff]   ;;  %v1740_v7 = vld [vmem:[%s2157_s0 + $0x10] sm:$0xff]  }
   0x3   :  { %1404 = vmatpush3.bf16.msra.mxu0 %v1691_v0  ;;  %1436 = vmatpush3.bf16.msra.mxu1 %v1691_v0  ;;  %v1584_v4 = vld [vmem:[%s2160_s1] sm:$0xff]   ;;  %v1749_v8 = vld [vmem:[%s2157_s0 + $0x8] sm:$0xff]   ;;  %v1588_v12 = vld [vmem:[%s2160_s1 + $0x10] sm:$0xff]  }
   0x4   :  { %1405 = vmatprep.subr.bf16.mxu0 %v1696_v1  ;;  %1437 = vmatprep.subr.bf16.mxu1 %v1696_v1  ;;  %v1585_v5 = vld [vmem:[%s2160_s1 + $0x40] sm:$0xff]   ;;  %v1586_v10 = vld [vmem:[%s2160_s1 + $0x8] sm:$0xff]   ;;  %v1589_v13 = vld [vmem:[%s2160_s1 + $0x50] sm:$0xff]  }
   0x5   :  { %1419 = vmatprep.mubr.bf16.mxu0 %v1584_v4  ;;  %1451 = vmatprep.mubr.bf16.mxu1 %v1585_v5  ;;  %v1758_v9 = vld [vmem:[%s2157_s0] sm:$0xff]   ;;  %v1587_v11 = vld [vmem:[%s2160_s1 + $0x48] sm:$0xff]   ;;  %v1590_v14 = vld [vmem:[%s2160_s1 + $0x18] sm:$0xff]  }
   0x6   :  { %v1591_v15 = vld [vmem:[%s2160_s1 + $0x58] sm:$0xff]   ;;  %v1592_v16 = vld [vmem:[%s2160_s1 + $0x20] sm:$0xff]   ;;  %v1594_v18 = vld [vmem:[%s2160_s1 + $0x28] sm:$0xff]  }
   0x7   :  { %1406 = vmatpush3.bf16.msra.mxu0 %v1696_v1  ;;  %1438 = vmatpush3.bf16.msra.mxu1 %v1696_v1  ;;  %v1593_v17 = vld [vmem:[%s2160_s1 + $0x60] sm:$0xff]   ;;  %v1595_v19 = vld [vmem:[%s2160_s1 + $0x68] sm:$0xff]   ;;  %v1596_v20 = vld [vmem:[%s2160_s1 + $0x30] sm:$0xff]  }
   0x8   :  { %1407 = vmatprep.subr.bf16.mxu0 %v1707_v2  ;;  %1439 = vmatprep.subr.bf16.mxu1 %v1707_v2  ;;  %v1598_v21 = vld [vmem:[%s2160_s1 + $0x70] sm:$0xff]   ;;  %v1597_v22 = vld [vmem:[%s2160_s1 + $0x38] sm:$0xff]   ;;  %v1600_v24 = vld [vmem:[%s2161_s3] sm:$0x3f]  }
   0x9   :  { %v1599_v23 = vld [vmem:[%s2160_s1 + $0x78] sm:$0xff]   ;;  %v553_v25 = vsel %vm551_vm0, %v1600_v24, 0  ;;  %s1641_s1 = smov 8  }
   0xb   :  { %1408 = vmatpush3.bf16.msra.mxu0 %v1707_v2  ;;  %1440 = vmatpush3.bf16.msra.mxu1 %v1707_v2 }
   0xc   :  { %1409 = vmatprep.subr.bf16.mxu0 %v1714_v3  ;;  %1441 = vmatprep.subr.bf16.mxu1 %v1714_v3 }
   0xf   :  { %1410 = vmatpush3.bf16.msra.mxu0 %v1714_v3  ;;  %1442 = vmatpush3.bf16.msra.mxu1 %v1714_v3 }
  0x10   :  { %1411 = vmatprep.subr.bf16.mxu0 %v1731_v6  ;;  %1443 = vmatprep.subr.bf16.mxu1 %v1731_v6 }
  0x13   :  { %1412 = vmatpush3.bf16.msra.mxu0 %v1731_v6  ;;  %1444 = vmatpush3.bf16.msra.mxu1 %v1731_v6 }
  0x14   :  { %1413 = vmatprep.subr.bf16.mxu0 %v1740_v7  ;;  %1445 = vmatprep.subr.bf16.mxu1 %v1740_v7 }
  0x17   :  { %1414 = vmatpush3.bf16.msra.mxu0 %v1740_v7  ;;  %1446 = vmatpush3.bf16.msra.mxu1 %v1740_v7 }
  0x18   :  { %1415 = vmatprep.subr.bf16.mxu0 %v1749_v8  ;;  %1447 = vmatprep.subr.bf16.mxu1 %v1749_v8 }
  0x1b   :  { %1416 = vmatpush3.bf16.msra.mxu0 %v1749_v8  ;;  %1448 = vmatpush3.bf16.msra.mxu1 %v1749_v8 }
  0x1c   :  { %1417 = vmatprep.subr.bf16.mxu0 %v1758_v9  ;;  %1449 = vmatprep.subr.bf16.mxu1 %v1758_v9 }
  0x1f   :  { %1418 = vmatpush3.bf16.msra.mxu0 %v1758_v9  ;;  %1450 = vmatpush3.bf16.msra.mxu1 %v1758_v9 }
  0x20   :  { %1543 = vmatprep.subr.msk.bf16.mxu0 %vm551_vm0, %v1600_v24  ;;  %1544 = vmatprep.subr.msk.bf16.mxu1 %vm551_vm0, %v1600_v24 }
  0x22   :  { %1420 = vmatmul.mubr.bf16.vlgmr.msra.gmra.mxu0 %v1586_v10  ;;  %1452 = vmatmul.mubr.bf16.vlgmr.msra.gmra.mxu1 %v1587_v11 }
  0x23   :  { %1423 = vmatprep.mubr.bf16.mxu0 %v1588_v12  ;;  %1455 = vmatprep.mubr.bf16.mxu1 %v1589_v13 }
  0x24   :  { %1468 = vmatpush3.bf16.msra.mxu0 %v553_v25  ;;  %1542 = vmatpush3.bf16.msra.mxu1 %v553_v25 }
  0x2a   :  { %1424 = vmatmul.mubr.bf16.gmra.mxu0 %v1590_v14  ;;  %1456 = vmatmul.mubr.bf16.gmra.mxu1 %v1591_v15 }
  0x2b   :  { %1427 = vmatprep.mubr.bf16.mxu0 %v1592_v16  ;;  %1459 = vmatprep.mubr.bf16.mxu1 %v1593_v17 }
  0x32   :  { %1428 = vmatmul.mubr.bf16.gmra.mxu0 %v1594_v18  ;;  %1460 = vmatmul.mubr.bf16.gmra.mxu1 %v1595_v19 }
  0x33   :  { %1431 = vmatprep.mubr.bf16.mxu0 %v1596_v20  ;;  %1463 = vmatprep.mubr.bf16.mxu1 %v1598_v21 }
  0x3a   :  { %1432 = vmatmul.mubr.bf16.gmra.mxu0 %v1597_v22  ;;  %1464 = vmatmul.mubr.bf16.gmra.mxu1 %v1599_v23 }
  0xe2   :  { %v1421_v26 = vpop.f32.mrf.mxu0  ;;  %v1453_v27 = vpop.f32.mrf.mxu1 }
  0xe4   :  { %v189_v28 = vpop.f32.mrf.mxu0  ;;  %v359_v29 = vpop.f32.mrf.mxu1 }
  0xe6   :  { %v1422_v30 = vpop.f32.mrf.mxu0  ;;  %v1454_v31 = vpop.f32.mrf.mxu1 }
  0xe7   :  { %v253_v32 = vpack.c.bf16 %v1422_v30, %v1421_v26  ;;  %v423_v33 = vpack.c.bf16 %v1454_v31, %v1453_v27 }
  0xe8   :  { %v192_v34 = vpop.f32.mrf.mxu0  ;;  %v362_v35 = vpop.f32.mrf.mxu1 }
  0xe9   :  { %464 = vrot.lane.b32.xlu0 %v423_v33, %s1641_s1  ;;  %440 = vrot.lane.b32.xlu1 %v253_v32, %s1642_s26  ;;  %v252_v38 = vpack.c.bf16 %v192_v34, %v189_v28  ;;  %v422_v43 = vpack.c.bf16 %v362_v35, %v359_v29 }
  0xea   :  { %v1425_v36 = vpop.f32.mrf.mxu0  ;;  %v1457_v37 = vpop.f32.mrf.mxu1 }
  0xec   :  { %v205_v39 = vpop.f32.mrf.mxu0  ;;  %v375_v40 = vpop.f32.mrf.mxu1 }
  0xed   :  { %438 = vrot.lane.b32.xlu0 %v252_v38, %s1642_s26 }
  0xee   :  { %v1426_v41 = vpop.f32.mrf.mxu0  ;;  %v1458_v42 = vpop.f32.mrf.mxu1 }
  0xef   :  { %v255_v61 = vpack.c.bf16 %v1426_v41, %v1425_v36  ;;  %v425_v13 = vpack.c.bf16 %v1458_v42, %v1457_v37 }
  0xf0   :  { %v208_v44 = vpop.f32.mrf.mxu0  ;;  %v378_v45 = vpop.f32.mrf.mxu1 }
  0xf1   :  { %462 = vrot.lane.b32.xlu0 %v422_v43, %s1641_s1  ;;  %v254_v48 = vpack.c.bf16 %v208_v44, %v205_v39  ;;  %v424_v5 = vpack.c.bf16 %v378_v45, %v375_v40  ;;  %v1862_v44 = vld [vmem:[%s2162_s4] sm:$0xf]  ;;  %v1872_v45 = vld [vmem:[%s2162_s4 + $0x8] sm:$0xf] }
  0xf2   :  { %v1429_v46 = vpop.f32.mrf.mxu0  ;;  %v1461_v47 = vpop.f32.mrf.mxu1 }
  0xf4   :  { %v221_v49 = vpop.f32.mrf.mxu0  ;;  %v391_v50 = vpop.f32.mrf.mxu1 }
  0xf5   :  { %442 = vrot.lane.b32.xlu0 %v254_v48, %s1642_s26  ;;  %v1892_v48 = vld [vmem:[%s2162_s4 + $0x18] sm:$0xf] }
  0xf6   :  { %v1430_v51 = vpop.f32.mrf.mxu0  ;;  %v1462_v52 = vpop.f32.mrf.mxu1 }
  0xf7   :  { %v257_v53 = vpack.c.bf16 %v1430_v51, %v1429_v46  ;;  %v427_v58 = vpack.c.bf16 %v1462_v52, %v1461_v47  ;;  %v1882_v46 = vld [vmem:[%s2162_s4 + $0x10] sm:$0xf]  ;;  %v1887_v47 = vld [vmem:[%s2162_s4 + $0x14] sm:$0xf]  ;;  %v1907_v51 = vld [vmem:[%s2162_s4 + $0x24] sm:$0xf] }
  0xf8   :  { %v224_v54 = vpop.f32.mrf.mxu0  ;;  %v394_v56 = vpop.f32.mrf.mxu1  ;;  %v1912_v52 = vld [vmem:[%s2162_s4 + $0x28] sm:$0xf] }
  0xf9   :  { %v256_v55 = vpack.c.bf16 %v224_v54, %v221_v49  ;;  %448 = vrot.lane.b32.xlu1 %v257_v53, %s1642_s26  ;;  %v426_v62 = vpack.c.bf16 %v394_v56, %v391_v50  ;;  %v1897_v49 = vld [vmem:[%s2162_s4 + $0x1c] sm:$0xf]  ;;  %v1902_v50 = vld [vmem:[%s2162_s4 + $0x20] sm:$0xf]  ;;  %v1917_v53 = vld [vmem:[%s2162_s4 + $0x2c] sm:$0xf] }
  0xfa   :  { %v1433_v57 = vpop.f32.mrf.mxu0  ;;  %v1465_v60 = vpop.f32.mrf.mxu1  ;;  %v1922_v54 = vld [vmem:[%s2163_s5] sm:$0xf]  ;;  %v1932_v56 = vld [vmem:[%s2163_s5 + $0x8] sm:$0xf] }
  0xfb   :  { %446 = vrot.lane.b32.xlu0 %v256_v55, %s1642_s26  ;;  %v1927_v55 = vld [vmem:[%s2163_s5 + $0x4] sm:$0xf] }
  0xfc   :  { %v237_v59 = vpop.f32.mrf.mxu0  ;;  %v407_v4 = vpop.f32.mrf.mxu1 }
  0xfd   :  { %472 = vrot.lane.b32.xlu1 %v427_v58, %s1641_s1  ;;  %v1942_v58 = vld [vmem:[%s2163_s5 + $0x10] sm:$0xf] }
  0xfe   :  { %v1434_v63 = vpop.f32.mrf.mxu0  ;;  %v1466_v12 = vpop.f32.mrf.mxu1 }
  0xff   :  { %444 = vrot.lane.b32.xlu0 %v255_v61, %s1642_s26  ;;  %v259_v10 = vpack.c.bf16 %v1434_v63, %v1433_v57  ;;  %v429_v17 = vpack.c.bf16 %v1466_v12, %v1465_v60  ;;  %v1937_v57 = vld [vmem:[%s2163_s5 + $0xc] sm:$0xf]  ;;  %v1952_v60 = vld [vmem:[%s2163_s5 + $0x18] sm:$0xf]  ;;  %v1957_v61 = vld [vmem:[%s2163_s5 + $0x1c] sm:$0xf] }
 0x100   :  { %v240_v11 = vpop.f32.mrf.mxu0  ;;  %v410_v15 = vpop.f32.mrf.mxu1  ;;  %v1967_v63 = vld [vmem:[%s2163_s5 + $0x24] sm:$0xf] }
 0x101   :  { %470 = vrot.lane.b32.xlu1 %v426_v62, %s1641_s1  ;;  %v258_v14 = vpack.c.bf16 %v240_v11, %v237_v59  ;;  %v428_v16 = vpack.c.bf16 %v410_v15, %v407_v4  ;;  %v1947_v59 = vld [vmem:[%s2163_s5 + $0x14] sm:$0xf]  ;;  %v1962_v62 = vld [vmem:[%s2163_s5 + $0x20] sm:$0xf]  ;;  %v1972_v4 = vld [vmem:[%s2163_s5 + $0x28] sm:$0xf] }
 0x103   :  { %466 = vrot.lane.b32.xlu0 %v424_v5, %s1641_s1  ;;  %v1977_v5 = vld [vmem:[%s2163_s5 + $0x2c] sm:$0xf]  ;;  %s2002_s5 = smov 0  }
 0x105   :  { %452 = vrot.lane.b32.xlu1 %v259_v10, %s1642_s26  ;;  %v1278_v10 = vld [vmem:[%s2164_s6] ss:$0 sm:$0xff] }
 0x107   :  { %468 = vrot.lane.b32.xlu0 %v425_v13, %s1641_s1 }
 0x109   :  { %450 = vrot.lane.b32.xlu1 %v258_v14, %s1642_s26 }
 0x10d   :  { %474 = vrot.lane.b32.xlu1 %v428_v16, %s1641_s1 }
 0x111   :  { %476 = vrot.lane.b32.xlu1 %v429_v17, %s1641_s1 }
 0x15b   :  { %v465_v18 = vpop.permute.xlu0 %464  ;;  %v441_v19 = vpop.permute.xlu1 %440 }
 0x15c   :  { %v484_v21 = vsel %vm478_vm1, %v1749_v8, %v441_v19 }
 0x15d   :  { %v507_v25 = vsel %vm503_vm2, %v484_v21, %v465_v18 }
 0x15f   :  { %v439_v20 = vpop.permute.xlu0 %438 }
 0x160   :  { %v481_v22 = vsel %vm478_vm1, %v1758_v9, %v439_v20 }
 0x163   :  { %v463_v23 = vpop.permute.xlu0 %462 }
 0x164   :  { %v505_v24 = vsel %vm503_vm2, %v481_v22, %v463_v23 }
 0x165   :  { %1469 = vmatprep.mubr.msk.bf16.mxu0 %vm534_vm3, %v505_v24 }
 0x166   :  { %1470 = vmatmul.mubr.msk.bf16.vlgmr.msra.gmra.mxu0 %vm534_vm3, %v507_v25 }
 0x167   :  { %v443_v26 = vpop.permute.xlu0 %442 }
 0x168   :  { %v487_v33 = vsel %vm478_vm1, %v1740_v7, %v443_v26 }
 0x16b   :  { %v449_v27 = vpop.permute.xlu1 %448 }
 0x16c   :  { %v496_v9 = vsel %vm478_vm1, %v1707_v2, %v449_v27 }
 0x16d   :  { %v447_v28 = vpop.permute.xlu0 %446 }
 0x16e   :  { %v493_v8 = vsel %vm478_vm1, %v1714_v3, %v447_v28 }
 0x16f   :  { %v473_v29 = vpop.permute.xlu1 %472 }
 0x170   :  { %v515_v34 = vsel %vm503_vm2, %v496_v9, %v473_v29 }
 0x171   :  { %v445_v30 = vpop.permute.xlu0 %444 }
 0x172   :  { %v490_v2 = vsel %vm478_vm1, %v1731_v6, %v445_v30 }
 0x173   :  { %v471_v31 = vpop.permute.xlu1 %470 }
 0x174   :  { %v513_v32 = vsel %vm503_vm2, %v493_v8, %v471_v31 }
 0x175   :  { %1477 = vmatprep.mubr.msk.bf16.mxu1 %vm534_vm3, %v513_v32  ;;  %v467_v35 = vpop.permute.xlu0 %466 }
 0x176   :  { %v509_v36 = vsel %vm503_vm2, %v487_v33, %v467_v35  ;;  %1478 = vmatmul.mubr.msk.bf16.vlgmr.msra.gmra.mxu1 %vm534_vm3, %v515_v34 }
 0x177   :  { %1473 = vmatprep.mubr.msk.bf16.mxu0 %vm534_vm3, %v509_v36  ;;  %v453_v3 = vpop.permute.xlu1 %452 }
 0x178   :  { %v502_v42 = vsel %vm478_vm1, %v1691_v0, %v453_v3  ;;  %v1877_v0 = vld [vmem:[%s2162_s4 + $0xc] sm:$0xf] }
 0x179   :  { %v469_v37 = vpop.permute.xlu0 %468 }
 0x17a   :  { %v511_v38 = vsel %vm503_vm2, %v490_v2, %v469_v37 }
 0x17b   :  { %1474 = vmatmul.mubr.msk.bf16.gmra.mxu0 %vm534_vm3, %v511_v38  ;;  %v451_v7 = vpop.permute.xlu1 %450 }
 0x17c   :  { %v499_v39 = vsel %vm478_vm1, %v1696_v1, %v451_v7  ;;  %v1867_v1 = vld [vmem:[%s2162_s4 + $0x4] sm:$0xf]  ;;  %v1998_v7 = vmov 0.0  }
 0x17f   :  { %v475_v40 = vpop.permute.xlu1 %474 }
 0x180   :  { %v517_v41 = vsel %vm503_vm2, %v499_v39, %v475_v40  ;;  %v2000_v39 = vmov 0.0  }
 0x181   :  { %1481 = vmatprep.mubr.msk.bf16.mxu1 %vm534_vm3, %v517_v41 }
 0x183   :  { %v477_v43 = vpop.permute.xlu1 %476 }
 0x184   :  { %v519_v6 = vsel %vm503_vm2, %v502_v42, %v477_v43 }
 0x185   :  { %1482 = vmatmul.mubr.msk.bf16.gmra.mxu1 %vm534_vm3, %v519_v6 }
 0x226   :  { %v1471_v11 = vpop.f32.mrf.mxu0 }
 0x227   :  { %v598_v12 = vadd.f32 %v1471_v11, %v1278_v10 }
 0x228   :  { %v589_v13 = vpop.f32.mrf.mxu0 }
 0x229   :  { %655 = vst.msk [vmem:[#allocation2 + $0x10] sm:$0xff] %vm652_vm4, %v598_v12  ;;  %v590_v14 = vadd.f32 %v1278_v10, %v589_v13 }
 0x22a   :  { %v1472_v15 = vpop.f32.mrf.mxu0 }
 0x22b   :  { %653 = vst.msk [vmem:[#allocation2] sm:$0xff] %vm652_vm4, %v590_v14  ;;  %v601_v16 = vadd.f32 %v1472_v15, %v1278_v10 }
 0x22c   :  { %v592_v17 = vpop.f32.mrf.mxu0 }
 0x22d   :  { %656 = vst.msk [vmem:[#allocation2 + $0x18] sm:$0xff] %vm652_vm4, %v601_v16  ;;  %v593_v18 = vadd.f32 %v1278_v10, %v592_v17 }
 0x22f   :  { %654 = vst.msk [vmem:[#allocation2 + $0x8] sm:$0xff] %vm652_vm4, %v593_v18 }
 0x236   :  { %v1479_v19 = vpop.f32.mrf.mxu1 }
 0x237   :  { %v630_v20 = vadd.f32 %v1479_v19, %v1278_v10 }
 0x238   :  { %v621_v21 = vpop.f32.mrf.mxu1 }
 0x239   :  { %663 = vst.msk [vmem:[#allocation2 + $0x50] sm:$0xff] %vm652_vm4, %v630_v20  ;;  %v622_v22 = vadd.f32 %v1278_v10, %v621_v21 }
 0x23a   :  { %v1480_v23 = vpop.f32.mrf.mxu1 }
 0x23b   :  { %661 = vst.msk [vmem:[#allocation2 + $0x40] sm:$0xff] %vm652_vm4, %v622_v22  ;;  %v633_v24 = vadd.f32 %v1480_v23, %v1278_v10  ;;  %v1475_v25 = vpop.f32.mrf.mxu0 }
 0x23c   :  { %v614_v26 = vadd.f32 %v1475_v25, %v1278_v10  ;;  %v624_v27 = vpop.f32.mrf.mxu1 }
 0x23d   :  { %664 = vst.msk [vmem:[#allocation2 + $0x58] sm:$0xff] %vm652_vm4, %v633_v24  ;;  %v625_v28 = vadd.f32 %v1278_v10, %v624_v27  ;;  %v605_v29 = vpop.f32.mrf.mxu0 }
 0x23e   :  { %659 = vst.msk [vmem:[#allocation2 + $0x30] sm:$0xff] %vm652_vm4, %v614_v26  ;;  %v606_v30 = vadd.f32 %v1278_v10, %v605_v29 }
 0x23f   :  { %662 = vst.msk [vmem:[#allocation2 + $0x48] sm:$0xff] %vm652_vm4, %v625_v28  ;;  %v1476_v8 = vpop.f32.mrf.mxu0 }
 0x240   :  { %657 = vst.msk [vmem:[#allocation2 + $0x20] sm:$0xff] %vm652_vm4, %v606_v30  ;;  %v617_v31 = vadd.f32 %v1476_v8, %v1278_v10 }
 0x241   :  { %v608_v9 = vpop.f32.mrf.mxu0 }
 0x242   :  { %660 = vst.msk [vmem:[#allocation2 + $0x38] sm:$0xff] %vm652_vm4, %v617_v31  ;;  %v609_v32 = vadd.f32 %v1278_v10, %v608_v9 }
 0x244   :  { %658 = vst.msk [vmem:[#allocation2 + $0x28] sm:$0xff] %vm652_vm4, %v609_v32 }
 0x245   :  { %v1483_v33 = vpop.f32.mrf.mxu1 }
 0x246   :  { %v646_v34 = vadd.f32 %v1483_v33, %v1278_v10 }
 0x247   :  { %v637_v35 = vpop.f32.mrf.mxu1 }
 0x248   :  { %667 = vst.msk [vmem:[#allocation2 + $0x70] sm:$0xff] %vm652_vm4, %v646_v34  ;;  %v638_v36 = vadd.f32 %v1278_v10, %v637_v35 }
 0x249   :  { %v1484_v3 = vpop.f32.mrf.mxu1 }
 0x24a   :  { %665 = vst.msk [vmem:[#allocation2 + $0x60] sm:$0xff] %vm652_vm4, %v638_v36  ;;  %v649_v2 = vadd.f32 %v1484_v3, %v1278_v10 }
 0x24b   :  { %v640_v37 = vpop.f32.mrf.mxu1 }
 0x24c   :  { %668 = vst.msk [vmem:[#allocation2 + $0x78] sm:$0xff] %vm652_vm4, %v649_v2  ;;  %v641_v38 = vadd.f32 %v1278_v10, %v640_v37 }
 0x24e   :  { %666 = vst.msk [vmem:[#allocation2 + $0x68] sm:$0xff] %vm652_vm4, %v641_v38 }
 0x24f LB: > { %v1643_v40 = vmov 0.0   ;;  %vm1644_vm5 = vmmov 0   ;;  %v712_v41 = vpack.c.bf16 %v1631_v7, %v1635_v39  ;;  %s2019_s6 = sshll.u32 %s1639_s5, 4  ;;  %v1329_v42 = vpack.c.bf16 %v1631_v7, %v1631_v7  ;;  %s1645_s3 = smov 96   ;;  %s1639_s5 = sphi %s2002_s5, %s698_s5   ;;  %v1635_v39 = vphi %v2000_v39, %v1203_v39   ;;  %v1631_v7 = vphi %v1998_v7, %v1204_v7  }
 0x250   : > { %1485 = vmatprep.subr.bf16.mxu0 %v1643_v40  ;;  %1487 = vmatprep.mubr.msk.bf16.mxu0 %vm1644_vm5, %v1643_v40  ;;  %s707_s26 = scalar_lea.vmem %s2158_s2, %s2019_s6  ;;  %vm735_vm6 = vcmask 130048   ;;  %v1328_v11 = vpack.c.bf16 %v1635_v39, %v1635_v39  ;;  %vm724_vm7 = vcmask 257024   ;;  %v1307_v13 = vcombine.low %v1912_v52, %v1917_v53  ;;  %s1646_s27 = smov 32  }
 0x251   : > { %1513 = vmatprep.subr.bf16.mxu1 %v1643_v40  ;;  %1515 = vmatprep.mubr.msk.bf16.mxu1 %vm1644_vm5, %v1643_v40  ;;  %v2032_v6 = vld [vmem:[%s707_s26] sm:$0xff]   ;;  %v2040_v10 = vld [vmem:[%s707_s26 + $0x8] sm:$0xff]   ;;  %v1306_v15 = vcombine.low %v1902_v50, %v1907_v51  ;;  %v1305_v16 = vcombine.low %v1892_v48, %v1897_v49  ;;  %v1304_v17 = vcombine.low %v1882_v46, %v1887_v47  ;;  %s1647_s28 = smov 64   ;;  %vm792_vm8 = vcmask 519424   ;;  %s702_s29 = scalar_lea.vmem [#allocation2], %s2019_s6 }
 0x252   : > { %732 = vrot.lane.b32.xlu0 %v712_v41, %s1645_s3  ;;  %720 = vrot.lane.b32.xlu1 %v1329_v42, %s1645_s3  ;;  %v1303_v21 = vcombine.low %v1872_v45, %v1877_v0  ;;  %v1302_v23 = vcombine.low %v1862_v44, %v1867_v1  ;;  %vm856_vm9 = vcmask 781824   ;;  %s1213_s4 = scalar_lea.vmem %s2159_s7, %s2019_s6  ;;  %vm1214_vm10 = vcmask 261120   ;;  %s698_s5 = sadd.s32 1, %s1639_s5  }
 0x253   : > { %p695_p0 = scmp.ge.s32.totalorder %s698_s5, 8  }
 0x255   : > { %v2082_v35 = vld [vmem:[%s702_s29] sm:$0xff]  ;;  %v2085_v37 = vld [vmem:[%s702_s29 + $0x8] sm:$0xff] }
 0x256   : > { %718 = vrot.lane.b32.xlu0 %v1328_v11, %s1645_s3 }
 0x2c4   : > { %v733_v43 = vpop.permute.xlu0 %732  ;;  %v721_v12 = vpop.permute.xlu1 %720 }
 0x2c5   : > { %1486 = vmatpush3.bf16.msra.mxu0 %v733_v43  ;;  %726 = vst.msk [vmem:[#allocation3 + $0x4] sm:$0xf] %vm724_vm7, %v721_v12 }
 0x2c6   : > { %1491 = vmatprep.subr.bf16.mxu0 %v1643_v40 }
 0x2c8   : > { %1488 = vmatmul.mubr.msk.bf16.vlgmr.msra.gmra.mxu0 %vm735_vm6, %v2032_v6  ;;  %v719_v14 = vpop.permute.xlu0 %718 }
 0x2c9   : > { %1492 = vmatpush3.bf16.msra.mxu0 %v733_v43  ;;  %1493 = vmatprep.mubr.msk.bf16.mxu0 %vm1644_vm5, %v1643_v40  ;;  %725 = vst.msk [vmem:[#allocation3] sm:$0xf] %vm724_vm7, %v719_v14 }
 0x2ca   : > { %1497 = vmatprep.subr.bf16.mxu0 %v1643_v40 }
 0x2d0   : > { %1494 = vmatmul.mubr.msk.bf16.vlgmr.msra.gmra.mxu0 %vm735_vm6, %v2040_v10 }
 0x2d1   : > { %1509 = vmatprep.mubr.msk.bf16.mxu0 %vm1644_vm5, %v1643_v40  ;;  %1498 = vmatpush3.bf16.msra.mxu0 %v1307_v13 }
 0x2d2   : > { %1499 = vmatprep.subr.bf16.mxu0 %v1643_v40 }
 0x2d5   : > { %1500 = vmatpush3.bf16.msra.mxu0 %v1306_v15 }
 0x2d6   : > { %1501 = vmatprep.subr.bf16.mxu0 %v1643_v40 }
 0x2d9   : > { %1502 = vmatpush3.bf16.msra.mxu0 %v1305_v16 }
 0x2da   : > { %1503 = vmatprep.subr.bf16.mxu0 %v1643_v40 }
 0x2dd   : > { %1504 = vmatpush3.bf16.msra.mxu0 %v1304_v17 }
 0x2de   : > { %1505 = vmatprep.subr.bf16.mxu0 %v1643_v40 }
 0x2e1   : > { %1506 = vmatpush3.bf16.msra.mxu0 %v1303_v21 }
 0x2e2   : > { %1507 = vmatprep.subr.bf16.mxu0 %v1643_v40 }
 0x2e5   : > { %1508 = vmatpush3.bf16.msra.mxu0 %v1302_v23 }
 0x388   : > { %v773_v18 = vpop.f32.mrf.mxu0 }
 0x389   : > { %v1330_v19 = vpack.c.bf16 %v773_v18, %v773_v18 }
 0x38a   : > { %v1489_v20 = vpop.f32.mrf.mxu0 }
 0x38b   : > { %786 = vrot.lane.b32.xlu1 %v1330_v19, %s1646_s27 }
 0x38c   : > { %v776_v22 = vpop.f32.mrf.mxu0 }
 0x38d   : > { %v1331_v24 = vpack.c.bf16 %v776_v22, %v776_v22 }
 0x38e   : > { %v1490_v25 = vpop.f32.mrf.mxu0 }
 0x38f   : > { %788 = vrot.lane.b32.xlu0 %v1331_v24, %s1646_s27  ;;  %v1325_v25 = vcombine.low %v1972_v4, %v1977_v5 }
 0x390   : > { %v837_v26 = vpop.f32.mrf.mxu0 }
 0x391   : > { %v1332_v27 = vpack.c.bf16 %v837_v26, %v837_v26  ;;  %v1323_v26 = vcombine.low %v1952_v60, %v1957_v61 }
 0x392   : > { %v1495_v28 = vpop.f32.mrf.mxu0 }
 0x393   : > { %850 = vrot.lane.b32.xlu1 %v1332_v27, %s1647_s28 }
 0x394   : > { %v840_v29 = vpop.f32.mrf.mxu0 }
 0x395   : > { %v1333_v30 = vpack.c.bf16 %v840_v29, %v840_v29 }
 0x396   : > { %v1496_v8 = vpop.f32.mrf.mxu0 }
 0x397   : > { %852 = vrot.lane.b32.xlu0 %v1333_v30, %s1647_s28  ;;  %962 = vrot.lane.b32.xlu1 %v1635_v39, %s1645_s3  ;;  %v1321_v30 = vcombine.low %v1932_v56, %v1937_v57 }
 0x39b   : > { %964 = vrot.lane.b32.xlu0 %v1631_v7, %s1645_s3 }
 0x3fd   : > { %v787_v31 = vpop.permute.xlu1 %786 }
 0x3fe   : > { %793 = vst.msk [vmem:[#allocation3] sm:$0xf] %vm792_vm8, %v787_v31  ;;  %v1320_v31 = vcombine.low %v1922_v54, %v1927_v55 }
 0x401   : > { %v789_v9 = vpop.permute.xlu0 %788 }
 0x402   : > { %794 = vst.msk [vmem:[#allocation3 + $0x4] sm:$0xf] %vm792_vm8, %v789_v9 }
 0x405   : > { %v851_v32 = vpop.permute.xlu1 %850 }
 0x406   : > { %857 = vst.msk [vmem:[#allocation3] sm:$0xf] %vm856_vm9, %v851_v32 }
 0x409   : > { %v853_v33 = vpop.permute.xlu0 %852  ;;  %v963_v16 = vpop.permute.xlu1 %962 }
 0x40a   : > { %858 = vst.msk [vmem:[#allocation3 + $0x4] sm:$0xf] %vm856_vm9, %v853_v33 }
 0x40d   : > { %v965_v19 = vpop.permute.xlu0 %964 }
 0x411   : > { %v1603_v34 = vld [vmem:[#allocation3] sm:$0xff]  }
 0x412   : > { %1510 = vmatmul.mubr.msk.bf16.vlgmr.msra.gmra.mxu0 %vm652_vm4, %v1603_v34 }
 0x4d2   : > { %v939_v36 = vpop.f32.mrf.mxu0 }
 0x4d3   : > { %v946_v3 = vadd.f32 %v939_v36, %v2082_v35 }
 0x4d4   : > { %v1511_v2 = vpop.f32.mrf.mxu0 }
 0x4d5   : > { %v1309_v38 = vmul.f32 -1.442695, %v946_v3 }
 0x4d6   : > { %v942_v41 = vpop.f32.mrf.mxu0 }
 0x4d7   : > { %1605 = vpow2.f32 %v1309_v38  ;;  %v947_v42 = vadd.f32 %v942_v41, %v2085_v37 }
 0x4d8   : > { %v1512_v43 = vpop.f32.mrf.mxu0 }
 0x4d9   : > { %v1310_v11 = vmul.f32 -1.442695, %v947_v42 }
 0x4db   : > { %1607 = vpow2.f32 %v1310_v11 }
 0x4e4   : > { %v1606_v12 = vpop.eup %1605 }
 0x4e5   : > { %v954_v13 = vadd.f32 1.0, %v1606_v12 }
 0x4e7   : > { %1609 = vrcp.f32 %v954_v13 }
 0x4e8   : > { %v1608_v14 = vpop.eup %1607 }
 0x4e9   : > { %v955_v15 = vadd.f32 1.0, %v1608_v14 }
 0x4eb   : > { %1611 = vrcp.f32 %v955_v15 }
 0x4f4   : > { %v2088_v17 = vpop.eup %1609 }
 0x4f5   : > { %v968_v18 = vmul.f32 %v2088_v17, %v963_v16 }
 0x4f7   : > { %v1334_v20 = vpack.c.bf16 %v968_v18, %v968_v18 }
 0x4f8   : > { %v2091_v21 = vpop.eup %1611 }
 0x4f9   : > { %978 = vst.msk [vmem:[#allocation3] sm:$0xf] %vm724_vm7, %v1334_v20  ;;  %v969_v22 = vmul.f32 %v2091_v21, %v965_v19 }
 0x4fb   : > { %v1335_v23 = vpack.c.bf16 %v969_v22, %v969_v22  ;;  %v970_v24 = vpack.c.bf16 %v969_v22, %v968_v18 }
 0x4fd   : > { %979 = vst.msk [vmem:[#allocation3 + $0x4] sm:$0xf] %vm724_vm7, %v1335_v23  ;;  %1514 = vmatpush3.bf16.msra.mxu1 %v970_v24 }
 0x4fe   : > { %1519 = vmatprep.subr.bf16.mxu1 %v1643_v40 }
 0x500   : > { %1516 = vmatmul.mubr.msk.bf16.vlgmr.msra.gmra.mxu1 %vm735_vm6, %v2032_v6  ;;  %v1324_v6 = vcombine.low %v1962_v62, %v1967_v63 }
 0x501   : > { %1520 = vmatpush3.bf16.msra.mxu1 %v970_v24  ;;  %1521 = vmatprep.mubr.msk.bf16.mxu1 %vm1644_vm5, %v1643_v40  ;;  %v1191_v24 = vsub.f32 1.0, %v2088_v17 }
 0x502   : > { %1525 = vmatprep.subr.bf16.mxu1 %v1643_v40 }
 0x508   : > { %1522 = vmatmul.mubr.msk.bf16.vlgmr.msra.gmra.mxu1 %vm735_vm6, %v2040_v10  ;;  %v1322_v10 = vcombine.low %v1942_v58, %v1947_v59 }
 0x509   : > { %1537 = vmatprep.mubr.msk.bf16.mxu1 %vm1644_vm5, %v1643_v40  ;;  %1526 = vmatpush3.bf16.msra.mxu1 %v1325_v25 }
 0x50a   : > { %1527 = vmatprep.subr.bf16.mxu1 %v1643_v40 }
 0x50d   : > { %1528 = vmatpush3.bf16.msra.mxu1 %v1324_v6  ;;  %v1189_v6 = vmul.f32 %v1635_v39, %v2088_v17 }
 0x50e   : > { %1529 = vmatprep.subr.bf16.mxu1 %v1643_v40 }
 0x511   : > { %1530 = vmatpush3.bf16.msra.mxu1 %v1323_v26 }
 0x512   : > { %1531 = vmatprep.subr.bf16.mxu1 %v1643_v40 }
 0x515   : > { %1532 = vmatpush3.bf16.msra.mxu1 %v1322_v10 }
 0x516   : > { %1533 = vmatprep.subr.bf16.mxu1 %v1643_v40 }
 0x519   : > { %1534 = vmatpush3.bf16.msra.mxu1 %v1321_v30 }
 0x51a   : > { %1535 = vmatprep.subr.bf16.mxu1 %v1643_v40 }
 0x51d   : > { %1536 = vmatpush3.bf16.msra.mxu1 %v1320_v31 }
 0x5c0   : > { %v1014_v27 = vpop.f32.mrf.mxu1 }
 0x5c1   : > { %v1336_v28 = vpack.c.bf16 %v1014_v27, %v1014_v27 }
 0x5c2   : > { %v1517_v29 = vpop.f32.mrf.mxu1 }
 0x5c3   : > { %1027 = vrot.lane.b32.xlu1 %v1336_v28, %s1646_s27 }
 0x5c4   : > { %v1017_v8 = vpop.f32.mrf.mxu1 }
 0x5c5   : > { %v1337_v9 = vpack.c.bf16 %v1017_v8, %v1017_v8 }
 0x5c6   : > { %v1518_v32 = vpop.f32.mrf.mxu1 }
 0x5c7   : > { %1029 = vrot.lane.b32.xlu0 %v1337_v9, %s1646_s27 }
 0x5c8   : > { %v1069_v33 = vpop.f32.mrf.mxu1 }
 0x5c9   : > { %v1338_v34 = vpack.c.bf16 %v1069_v33, %v1069_v33 }
 0x5ca   : > { %v1523_v36 = vpop.f32.mrf.mxu1 }
 0x5cb   : > { %1082 = vrot.lane.b32.xlu1 %v1338_v34, %s1647_s28 }
 0x5cc   : > { %v1072_v3 = vpop.f32.mrf.mxu1 }
 0x5cd   : > { %v1339_v2 = vpack.c.bf16 %v1072_v3, %v1072_v3 }
 0x5ce   : > { %v1524_v38 = vpop.f32.mrf.mxu1 }
 0x5cf   : > { %1084 = vrot.lane.b32.xlu0 %v1339_v2, %s1647_s28 }
 0x635   : > { %v1028_v41 = vpop.permute.xlu1 %1027 }
 0x636   : > { %1033 = vst.msk [vmem:[#allocation3] sm:$0xf] %vm792_vm8, %v1028_v41 }
 0x639   : > { %v1030_v42 = vpop.permute.xlu0 %1029 }
 0x63a   : > { %1034 = vst.msk [vmem:[#allocation3 + $0x4] sm:$0xf] %vm792_vm8, %v1030_v42 }
 0x63d   : > { %v1083_v40 = vpop.permute.xlu1 %1082 }
 0x63e   : > { %1088 = vst.msk [vmem:[#allocation3] sm:$0xf] %vm856_vm9, %v1083_v40 }
 0x641   : > { %v1085_v43 = vpop.permute.xlu0 %1084 }
 0x642   : > { %1089 = vst.msk [vmem:[#allocation3 + $0x4] sm:$0xf] %vm856_vm9, %v1085_v43 }
 0x649   : > { %v1604_v11 = vld [vmem:[#allocation3] sm:$0xff]  }
 0x64a   : > { %1538 = vmatmul.mubr.msk.bf16.vlgmr.msra.gmra.mxu1 %vm652_vm4, %v1604_v11 }
 0x70a   : > { %v1170_v12 = vpop.f32.mrf.mxu1 }
 0x70b   : > { %1179 = vrot.lane.b32.xlu1 %v1170_v12, %s1647_s28 }
 0x70c   : > { %v1539_v13 = vpop.f32.mrf.mxu1 }
 0x70e   : > { %v1173_v14 = vpop.f32.mrf.mxu1 }
 0x70f   : > { %1181 = vrot.lane.b32.xlu0 %v1173_v14, %s1647_s28 }
 0x710   : > { %v1540_v15 = vpop.f32.mrf.mxu1 }
 0x77d   : > { %v1180_v16 = vpop.permute.xlu1 %1179 }
 0x77e   : > { %v1185_v18 = vadd.f32 %v1180_v16, %v2082_v35  ;;  %v1192_v35 = vsub.f32 1.0, %v2091_v21 }
 0x780   : > { %1613 = vtanh.f32 %v1185_v18 }
 0x781   : > { %v1182_v19 = vpop.permute.xlu0 %1181 }
 0x782   : > { %v1186_v20 = vadd.f32 %v1182_v19, %v2085_v37  ;;  %v1190_v37 = vmul.f32 %v1631_v7, %v2091_v21 }
 0x784   : > { %1615 = vtanh.f32 %v1186_v20 }
 0x78d   : > { %v1614_v22 = vpop.eup %1613 }
 0x78e   : > { %1195 = vrot.lane.b32.xlu1 %v1614_v22, %s1645_s3 }
 0x791   : > { %v1616_v23 = vpop.eup %1615 }
 0x792   : > { %1197 = vrot.lane.b32.xlu0 %v1616_v23, %s1645_s3 }
 0x800   : > { %v1196_v25 = vpop.permute.xlu1 %1195 }
 0x801   : > { %v1201_v26 = vmul.f32 %v1196_v25, %v1191_v24 }
 0x803   : > { %v1203_v39 = vadd.f32 %v1201_v26, %v1189_v6  }
 0x804   : > { %v1198_v10 = vpop.permute.xlu0 %1197 }
 0x805   : > { %v1202_v27 = vmul.f32 %v1198_v10, %v1192_v35  ;;  %1207 = vrot.lane.b32.xlu1 %v1203_v39, %s1645_s3 }
 0x807   : > { %v1204_v7 = vadd.f32 %v1202_v27, %v1190_v37  }
 0x809   : > { %1209 = vrot.lane.b32.xlu0 %v1204_v7, %s1645_s3 }
 0x877   : > { %v1208_v17 = vpop.permute.xlu1 %1207 }
 0x878   : > { %1215 = vst.msk [vmem:[%s1213_s4] sm:$0xff] %vm1214_vm10, %v1208_v17  ;;  %697 = sbr.rel (!%p695_p0) target bundleno = 591 (0x24f), region = 59 }
 0x87b   : > { %v1210_v28 = vpop.permute.xlu0 %1209 }
 0x87c   : > { %1216 = vst.msk [vmem:[%s1213_s4 + $0x8] sm:$0xff] %vm1214_vm10, %v1210_v28 }

</bundles_post_ra>
